<compile_context>
chip_gen: v6e
topology: v6e:2x2x1
jax: 0.10.0
libtpu: 0.0.40
codegen_flags: <defaults>
</compile_context>

<pallas_src>
import jax
import jax.numpy as jnp
from jax.experimental import pallas as pl
from jax.experimental.pallas import tpu as pltpu


def policy_net3_kernel(x_ref,
                       w1_ref, b1_ref,
                       w2_ref, b2_ref,
                       w3_ref, b3_ref,
                       w4_ref, b4_ref,
                       out_ref):
    # Feature-major: x_ref is (in_features, TB); weights are (out, in); biases (out, 1).
    # fc1 + relu
    h = jnp.dot(w1_ref[...], x_ref[...], preferred_element_type=jnp.float32) + b1_ref[...]
    h = jnp.maximum(h, 0.0)
    # fc2 + relu
    h = jnp.dot(w2_ref[...], h, preferred_element_type=jnp.float32) + b2_ref[...]
    h = jnp.maximum(h, 0.0)
    # fc3 + relu
    h = jnp.dot(w3_ref[...], h, preferred_element_type=jnp.float32) + b3_ref[...]
    h = jnp.maximum(h, 0.0)
    # fc4 + softmax over the feature (sublane) axis, numerically stable.
    logits = jnp.dot(w4_ref[...], h, preferred_element_type=jnp.float32) + b4_ref[...]
    m = jnp.max(logits, axis=0, keepdims=True)
    e = jnp.exp(logits - m)
    s = jnp.sum(e, axis=0, keepdims=True)
    # Exact divide: softmax rows must sum to 1 within tight tolerance.
    out_ref[...] = e / s


def policy_network3_forward(x, params, *, batch_tile=2048):
    """x: (B, input_size) float32.
    params: w1..w4 as (out_features, in_features), b1..b4 as (out_features, 1)."""
    B, in_size = x.shape
    h1 = params["w1"].shape[0]
    h2 = params["w2"].shape[0]
    h3 = params["w3"].shape[0]
    out_size = params["w4"].shape[0]

    # Feature-major input: batch on the 128-lane axis.
    x_t = x.T  # (in_size, B)

    # Batch-tile selection:
    #  * small B: one full-batch tile (block == full array -> no (8,128) issue, no pad).
    #  * large B: a multiple-of-128 tile, capped at ~B/2 so v7x always gets >= 2 grid
    #    steps to shard across its two TensorCores; no wrapper padding (Pallas masks
    #    the ragged last tile's stores; columns are independent).
    if B <= 256:
        TB = B
    else:
        TB = min(batch_tile, 128 * pl.cdiv(pl.cdiv(B, 2), 128))
    grid = (pl.cdiv(B, TB),)

    x_spec = pl.BlockSpec((in_size, TB), lambda i: (0, i))
    out_spec = pl.BlockSpec((out_size, TB), lambda i: (0, i))

    # Weight-stationary: whole-array blocks with a constant index_map stay in VMEM
    # across all grid iterations.
    def const_spec(a):
        return pl.BlockSpec(a.shape, lambda i: (0, 0))

    weight_args = (params["w1"], params["b1"],
                   params["w2"], params["b2"],
                   params["w3"], params["b3"],
                   params["w4"], params["b4"])
    weight_specs = [const_spec(a) for a in weight_args]

    # Advisory cost estimate for XLA's scheduler.
    flops = int(2 * B * (in_size * h1 + h1 * h2 + h2 * h3 + h3 * out_size))
    weight_bytes = int(sum(a.size * a.dtype.itemsize for a in weight_args))
    bytes_accessed = int(B * (in_size + out_size) * 4 + weight_bytes)
    cost = pl.CostEstimate(flops=flops,
                           transcendentals=int(B * out_size),
                           bytes_accessed=bytes_accessed)

    out_t = pl.pallas_call(
        policy_net3_kernel,
        out_shape=jax.ShapeDtypeStruct((out_size, B), jnp.float32),
        grid=grid,
        in_specs=[x_spec] + weight_specs,
        out_specs=out_spec,
        compiler_params=pltpu.CompilerParams(
            # Batch axis is embarrassingly parallel -> shard across v7x's 2 TCs.
            dimension_semantics=("parallel",),
        ),
        cost_estimate=cost,
    )(x_t, *weight_args)

    # Back to the PyTorch (batch, features) layout.
    return out_t.T


def init_params(key, input_size, h1, h2, h3, output_size):
    """PyTorch-style uniform init; weights (out, in), biases (out, 1)."""
    dims = [(input_size, h1), (h1, h2), (h2, h3), (h3, output_size)]
    params = {}
    for i, (fan_in, fan_out) in enumerate(dims, start=1):
        key, kw, kb = jax.random.split(key, 3)
        bound = 1.0 / jnp.sqrt(jnp.float32(fan_in))
        params[f"w{i}"] = jax.random.uniform(
            kw, (fan_out, fan_in), jnp.float32, -bound, bound)
        params[f"b{i}"] = jax.random.uniform(
            kb, (fan_out, 1), jnp.float32, -bound, bound)
    return params


def reference_forward(x, params):
    def lin(h, w, b):
        return h @ w.T + b[:, 0]
    h = jnp.maximum(lin(x, params["w1"], params["b1"]), 0.0)
    h = jnp.maximum(lin(h, params["w2"], params["b2"]), 0.0)
    h = jnp.maximum(lin(h, params["w3"], params["b3"]), 0.0)
    return jax.nn.softmax(lin(h, params["w4"], params["b4"]), axis=-1)


if __name__ == "__main__":
    # Small shapes consistent with the module's forward: x is (batch, input_size).
    batch = 2
    input_size, h1, h2, h3, output_size = 16, 32, 32, 32, 8

    key = jax.random.PRNGKey(0)
    key, kx = jax.random.split(key)
    x = jax.random.normal(kx, (batch, input_size), jnp.float32)
    params = init_params(key, input_size, h1, h2, h3, output_size)

    out = policy_network3_forward(x, params)
    out = jax.block_until_ready(out)

    # Sanity: shape, softmax rows sum to 1, matches pure-JAX reference.
    assert out.shape == (batch, output_size)
    row_sums = jnp.sum(out, axis=-1)
    assert bool(jnp.all(jnp.abs(row_sums - 1.0) < 1e-3))
    ref = reference_forward(x, params)
    assert bool(jnp.all(jnp.abs(out - ref) < 1e-3))

    print("KERNEL_OK")
</pallas_src>

<mosaic_0001>
module attributes {stable_mosaic.version = 11 : i64} {
  func.func @policy_net3_kernel(%arg0: i32, %arg1: memref<16x2xf32, #tpu.memory_space<vmem>>, %arg2: memref<32x16xf32, #tpu.memory_space<vmem>>, %arg3: memref<32x1xf32, #tpu.memory_space<vmem>>, %arg4: memref<32x32xf32, #tpu.memory_space<vmem>>, %arg5: memref<32x1xf32, #tpu.memory_space<vmem>>, %arg6: memref<32x32xf32, #tpu.memory_space<vmem>>, %arg7: memref<32x1xf32, #tpu.memory_space<vmem>>, %arg8: memref<8x32xf32, #tpu.memory_space<vmem>>, %arg9: memref<8x1xf32, #tpu.memory_space<vmem>>, %arg10: memref<8x2xf32, #tpu.memory_space<vmem>>) attributes {dimension_semantics = [#tpu.dimension_semantics<parallel>], iteration_bounds = array<i64: 1>, scalar_prefetch = 0 : i64, scratch_operands = 0 : i64, tpu.core_type = #tpu.core_type<tc>, window_params = [{transform_indices = @transform_0, window_bounds = array<i64: 16, 2>}, {pipeline_mode = #tpu.pipeline_mode<synchronous>, transform_indices = @transform_1, window_bounds = array<i64: 32, 16>}, {pipeline_mode = #tpu.pipeline_mode<synchronous>, transform_indices = @transform_2, window_bounds = array<i64: 32, 1>}, {pipeline_mode = #tpu.pipeline_mode<synchronous>, transform_indices = @transform_3, window_bounds = array<i64: 32, 32>}, {pipeline_mode = #tpu.pipeline_mode<synchronous>, transform_indices = @transform_4, window_bounds = array<i64: 32, 1>}, {pipeline_mode = #tpu.pipeline_mode<synchronous>, transform_indices = @transform_5, window_bounds = array<i64: 32, 32>}, {pipeline_mode = #tpu.pipeline_mode<synchronous>, transform_indices = @transform_6, window_bounds = array<i64: 32, 1>}, {pipeline_mode = #tpu.pipeline_mode<synchronous>, transform_indices = @transform_7, window_bounds = array<i64: 8, 32>}, {pipeline_mode = #tpu.pipeline_mode<synchronous>, transform_indices = @transform_8, window_bounds = array<i64: 8, 1>}, {transform_indices = @transform_9, window_bounds = array<i64: 8, 2>}]} {
    %c0 = arith.constant 0 : index
    %c0_0 = arith.constant 0 : index
    %0 = vector.load %arg2[%c0, %c0_0] : memref<32x16xf32, #tpu.memory_space<vmem>>, vector<32x16xf32>
    %c0_1 = arith.constant 0 : index
    %c0_2 = arith.constant 0 : index
    %1 = vector.load %arg1[%c0_1, %c0_2] : memref<16x2xf32, #tpu.memory_space<vmem>>, vector<16x2xf32>
    %cst = arith.constant dense<0.000000e+00> : vector<32x2xf32>
    %2 = tpu.matmul %0, %1, %cst {dimension_numbers = #tpu.dot_dimension_numbers<[1], [0], [0], [1], [0, 0, 1, 1], [], []>} : vector<32x16xf32>, vector<16x2xf32>, vector<32x2xf32> -> vector<32x2xf32>
    %c0_3 = arith.constant 0 : index
    %c0_4 = arith.constant 0 : index
    %3 = vector.load %arg3[%c0_3, %c0_4] : memref<32x1xf32, #tpu.memory_space<vmem>>, vector<32x1xf32>
    %4 = vector.broadcast %3 : vector<32x1xf32> to vector<32x2xf32>
    %5 = arith.addf %2, %4 : vector<32x2xf32>
    %cst_5 = arith.constant 0.000000e+00 : f32
    %6 = vector.broadcast %cst_5 : f32 to vector<32x2xf32>
    %7 = arith.maximumf %5, %6 : vector<32x2xf32>
    %c0_6 = arith.constant 0 : index
    %c0_7 = arith.constant 0 : index
    %8 = vector.load %arg4[%c0_6, %c0_7] : memref<32x32xf32, #tpu.memory_space<vmem>>, vector<32x32xf32>
    %cst_8 = arith.constant dense<0.000000e+00> : vector<32x2xf32>
    %9 = tpu.matmul %8, %7, %cst_8 {dimension_numbers = #tpu.dot_dimension_numbers<[1], [0], [0], [1], [0, 0, 1, 1], [], []>} : vector<32x32xf32>, vector<32x2xf32>, vector<32x2xf32> -> vector<32x2xf32>
    %c0_9 = arith.constant 0 : index
    %c0_10 = arith.constant 0 : index
    %10 = vector.load %arg5[%c0_9, %c0_10] : memref<32x1xf32, #tpu.memory_space<vmem>>, vector<32x1xf32>
    %11 = vector.broadcast %10 : vector<32x1xf32> to vector<32x2xf32>
    %12 = arith.addf %9, %11 : vector<32x2xf32>
    %cst_11 = arith.constant 0.000000e+00 : f32
    %13 = vector.broadcast %cst_11 : f32 to vector<32x2xf32>
    %14 = arith.maximumf %12, %13 : vector<32x2xf32>
    %c0_12 = arith.constant 0 : index
    %c0_13 = arith.constant 0 : index
    %15 = vector.load %arg6[%c0_12, %c0_13] : memref<32x32xf32, #tpu.memory_space<vmem>>, vector<32x32xf32>
    %cst_14 = arith.constant dense<0.000000e+00> : vector<32x2xf32>
    %16 = tpu.matmul %15, %14, %cst_14 {dimension_numbers = #tpu.dot_dimension_numbers<[1], [0], [0], [1], [0, 0, 1, 1], [], []>} : vector<32x32xf32>, vector<32x2xf32>, vector<32x2xf32> -> vector<32x2xf32>
    %c0_15 = arith.constant 0 : index
    %c0_16 = arith.constant 0 : index
    %17 = vector.load %arg7[%c0_15, %c0_16] : memref<32x1xf32, #tpu.memory_space<vmem>>, vector<32x1xf32>
    %18 = vector.broadcast %17 : vector<32x1xf32> to vector<32x2xf32>
    %19 = arith.addf %16, %18 : vector<32x2xf32>
    %cst_17 = arith.constant 0.000000e+00 : f32
    %20 = vector.broadcast %cst_17 : f32 to vector<32x2xf32>
    %21 = arith.maximumf %19, %20 : vector<32x2xf32>
    %c0_18 = arith.constant 0 : index
    %c0_19 = arith.constant 0 : index
    %22 = vector.load %arg8[%c0_18, %c0_19] : memref<8x32xf32, #tpu.memory_space<vmem>>, vector<8x32xf32>
    %cst_20 = arith.constant dense<0.000000e+00> : vector<8x2xf32>
    %23 = tpu.matmul %22, %21, %cst_20 {dimension_numbers = #tpu.dot_dimension_numbers<[1], [0], [0], [1], [0, 0, 1, 1], [], []>} : vector<8x32xf32>, vector<32x2xf32>, vector<8x2xf32> -> vector<8x2xf32>
    %c0_21 = arith.constant 0 : index
    %c0_22 = arith.constant 0 : index
    %24 = vector.load %arg9[%c0_21, %c0_22] : memref<8x1xf32, #tpu.memory_space<vmem>>, vector<8x1xf32>
    %25 = vector.broadcast %24 : vector<8x1xf32> to vector<8x2xf32>
    %26 = arith.addf %23, %25 : vector<8x2xf32>
    %cst_23 = arith.constant dense<0xFF800000> : vector<2xf32>
    %27 = vector.multi_reduction <maximumf>, %26, %cst_23 [0] : vector<8x2xf32> to vector<2xf32>
    %28 = vector.shape_cast %27 : vector<2xf32> to vector<1x2xf32>
    %29 = vector.broadcast %28 : vector<1x2xf32> to vector<8x2xf32>
    %30 = arith.subf %26, %29 : vector<8x2xf32>
    %31 = math.exp %30 : vector<8x2xf32>
    %cst_24 = arith.constant dense<0.000000e+00> : vector<2xf32>
    %32 = vector.multi_reduction <add>, %31, %cst_24 [0] : vector<8x2xf32> to vector<2xf32>
    %33 = vector.shape_cast %32 : vector<2xf32> to vector<1x2xf32>
    %34 = vector.broadcast %33 : vector<1x2xf32> to vector<8x2xf32>
    %35 = arith.divf %31, %34 : vector<8x2xf32>
    %c0_25 = arith.constant 0 : index
    %c0_26 = arith.constant 0 : index
    %36 = vector.load %arg10[%c0_25, %c0_26] : memref<8x2xf32, #tpu.memory_space<vmem>>, vector<8x2xf32>
    tpu.vector_store %arg10[%c0_25, %c0_26], %35 {strides = array<i32>} : memref<8x2xf32, #tpu.memory_space<vmem>>, vector<8x2xf32>,
    return
  }
  func.func @transform_0(%arg0: i32) -> (i32, i32) {
    %c0_i32 = arith.constant 0 : i32
    %c0_i32_0 = arith.constant 0 : i32
    return %c0_i32, %arg0 : i32, i32
  }
  func.func @transform_1(%arg0: i32) -> (i32, i32) {
    %c0_i32 = arith.constant 0 : i32
    %c0_i32_0 = arith.constant 0 : i32
    %c0_i32_1 = arith.constant 0 : i32
    return %c0_i32, %c0_i32_0 : i32, i32
  }
  func.func @transform_2(%arg0: i32) -> (i32, i32) {
    %c0_i32 = arith.constant 0 : i32
    %c0_i32_0 = arith.constant 0 : i32
    %c0_i32_1 = arith.constant 0 : i32
    return %c0_i32, %c0_i32_0 : i32, i32
  }
  func.func @transform_3(%arg0: i32) -> (i32, i32) {
    %c0_i32 = arith.constant 0 : i32
    %c0_i32_0 = arith.constant 0 : i32
    %c0_i32_1 = arith.constant 0 : i32
    return %c0_i32, %c0_i32_0 : i32, i32
  }
  func.func @transform_4(%arg0: i32) -> (i32, i32) {
    %c0_i32 = arith.constant 0 : i32
    %c0_i32_0 = arith.constant 0 : i32
    %c0_i32_1 = arith.constant 0 : i32
    return %c0_i32, %c0_i32_0 : i32, i32
  }
  func.func @transform_5(%arg0: i32) -> (i32, i32) {
    %c0_i32 = arith.constant 0 : i32
    %c0_i32_0 = arith.constant 0 : i32
    %c0_i32_1 = arith.constant 0 : i32
    return %c0_i32, %c0_i32_0 : i32, i32
  }
  func.func @transform_6(%arg0: i32) -> (i32, i32) {
    %c0_i32 = arith.constant 0 : i32
    %c0_i32_0 = arith.constant 0 : i32
    %c0_i32_1 = arith.constant 0 : i32
    return %c0_i32, %c0_i32_0 : i32, i32
  }
  func.func @transform_7(%arg0: i32) -> (i32, i32) {
    %c0_i32 = arith.constant 0 : i32
    %c0_i32_0 = arith.constant 0 : i32
    %c0_i32_1 = arith.constant 0 : i32
    return %c0_i32, %c0_i32_0 : i32, i32
  }
  func.func @transform_8(%arg0: i32) -> (i32, i32) {
    %c0_i32 = arith.constant 0 : i32
    %c0_i32_0 = arith.constant 0 : i32
    %c0_i32_1 = arith.constant 0 : i32
    return %c0_i32, %c0_i32_0 : i32, i32
  }
  func.func @transform_9(%arg0: i32) -> (i32, i32) {
    %c0_i32 = arith.constant 0 : i32
    %c0_i32_0 = arith.constant 0 : i32
    return %c0_i32, %arg0 : i32, i32
  }
}

</mosaic_0001>

<bundles_post_ra>
// kernel: tpu_custom_call.1
= control target key start
LH: loop header
LB: loop body
LE: loop exit
PB: predicated region body
PF: predicated region fallthrough
CT: control target
= control target key end

     0   :  { %vm62_vm0 = vcmask 130048   ;;  %v626_v3 = vmov 0   ;;  %vm192_vm1 = vcmask 261120   ;;  %v627_v60 = vmov 0.0   ;;  %s782_s0 = inlined_call_operand.vmem [shape: f32[16,2], index: 0, kind: input, shape index: {}]   ;;  %s783_s1 = inlined_call_operand.vmem [shape: f32[32,16], index: 1, kind: input, shape index: {}]   ;;  %s784_s2 = inlined_call_operand.vmem [shape: f32[32,1], index: 2, kind: input, shape index: {}]   ;;  %s785_s4 = inlined_call_operand.vmem [shape: f32[32,1], index: 4, kind: input, shape index: {}]   ;;  %s786_s6 = inlined_call_operand.vmem [shape: f32[32,1], index: 6, kind: input, shape index: {}]   ;;  %s787_s8 = inlined_call_operand.vmem [shape: f32[8,1], index: 8, kind: input, shape index: {}]   ;;  %s788_s3 = inlined_call_operand.vmem [shape: f32[32,32], index: 3, kind: input, shape index: {}]   ;;  %s789_s5 = inlined_call_operand.vmem [shape: f32[32,32], index: 5, kind: input, shape index: {}]   ;;  %s790_s7 = inlined_call_operand.vmem [shape: f32[8,32], index: 7, kind: input, shape index: {}]   ;;  %s791_s9 = inlined_call_operand.vmem [shape: f32[8,2], index: 9, kind: output, shape index: {}]  }
   0x1   :  { %v37_v0 = vld [vmem:[%s782_s0 + $0x8] sm:$0xff]  ;;  %v36_v1 = vld [vmem:[%s782_s0] sm:$0xff]  ;;  %620 = vset.pattern.permute.xlu0 %v626_v3  ;;  %621 = vset.pattern.permute.xlu1 %v626_v3  ;;  %v41_v5 = vld [vmem:[%s784_s2 + $0x18] sm:$0xff]  ;;  %vm628_vm2 = vmmov 0   ;;  %vm503_vm3 = vcmask 15360  }
   0x2   :  { %v32_v2 = vld [vmem:[%s783_s1] sm:$0xff]  ;;  %568 = vmatprep.subr.mxu0 %v37_v0  ;;  %v33_v4 = vld [vmem:[%s783_s1 + $0x8] sm:$0xff]  ;;  %v34_v6 = vld [vmem:[%s783_s1 + $0x10] sm:$0xff]  ;;  %59 = vperm.xlu0 %620, %v41_v5  }
   0x3   :  { %572 = vmatprep.mubr.msk.f32.mxu0 %vm62_vm0, %v32_v2  ;;  %569 = vmatpush3.msra.mxu0 %v37_v0  ;;  %v39_v7 = vld [vmem:[%s784_s2 + $0x8] sm:$0xff]  ;;  %v40_v8 = vld [vmem:[%s784_s2 + $0x10] sm:$0xff]  ;;  %v38_v9 = vld [vmem:[%s784_s2] sm:$0xff] }
   0x4   :  { %570 = vmatprep.subr.mxu0 %v36_v1  ;;  %49 = vperm.xlu1 %621, %v39_v7   ;;  %v35_v10 = vld [vmem:[%s783_s1 + $0x18] sm:$0xff]  ;;  %v170_v12 = vld [vmem:[%s785_s4 + $0x10] sm:$0xff]  ;;  %v169_v13 = vld [vmem:[%s785_s4 + $0x8] sm:$0xff] }
   0x5   :  { %571 = vmatpush3.msra.mxu0 %v36_v1  ;;  %v171_v11 = vld [vmem:[%s785_s4 + $0x18] sm:$0xff]  ;;  %v168_v14 = vld [vmem:[%s785_s4] sm:$0xff]  ;;  %v300_v16 = vld [vmem:[%s786_s6 + $0x10] sm:$0xff] }
   0x6   :  { %573 = vmatmul.mubr.msk.f32.vlgmr.msra.gmra.mxu0 %vm62_vm0, %v33_v4  ;;  %54 = vperm.xlu0 %620, %v40_v8   ;;  %v301_v15 = vld [vmem:[%s786_s6 + $0x18] sm:$0xff]  ;;  %v299_v17 = vld [vmem:[%s786_s6 + $0x8] sm:$0xff]  ;;  %v298_v18 = vld [vmem:[%s786_s6] sm:$0xff] }
   0x7   :  { %575 = vmatprep.mubr.msk.f32.mxu0 %vm62_vm0, %v34_v6  ;;  %v424_v19 = vld [vmem:[%s787_s8] sm:$0xff]  ;;  %v165_v37 = vld [vmem:[%s788_s3 + $0x8] sm:$0xff]  ;;  %v166_v38 = vld [vmem:[%s788_s3 + $0x10] sm:$0xff] }
   0x8   :  { %44 = vperm.xlu1 %621, %v38_v9   ;;  %v164_v20 = vld [vmem:[%s788_s3] sm:$0xff]  ;;  %v167_v39 = vld [vmem:[%s788_s3 + $0x18] sm:$0xff]  ;;  %v295_v57 = vld [vmem:[%s789_s5 + $0x8] sm:$0xff] }
   0x9   :  { %586 = vmatprep.mubr.msk.f32.mxu1 %vm192_vm1, %v164_v20  ;;  %v294_v40 = vld [vmem:[%s789_s5] sm:$0xff]  ;;  %v296_v58 = vld [vmem:[%s789_s5 + $0x10] sm:$0xff]  ;;  %v297_v59 = vld [vmem:[%s789_s5 + $0x18] sm:$0xff] }
   0xa   :  { %576 = vmatmul.mubr.msk.f32.gmra.mxu0 %vm62_vm0, %v35_v10  ;;  %189 = vperm.xlu0 %620, %v171_v11  }
   0xb   :  { %600 = vmatprep.mubr.msk.f32.mxu0 %vm192_vm1, %v294_v40 }
   0xc   :  { %184 = vperm.xlu1 %621, %v170_v12  }
   0xe   :  { %179 = vperm.xlu0 %620, %v169_v13   ;;  %v423_v13 = vld [vmem:[%s790_s7] sm:$0xff] }
  0x10   :  { %174 = vperm.xlu1 %621, %v168_v14  }
  0x12   :  { %319 = vperm.xlu0 %620, %v301_v15  }
  0x14   :  { %314 = vperm.xlu1 %621, %v300_v16  }
  0x16   :  { %309 = vperm.xlu0 %620, %v299_v17  }
  0x18   :  { %304 = vperm.xlu1 %621, %v298_v18  }
  0x1a   :  { %427 = vperm.xlu0 %620, %v424_v19  }
  0x7d   :  { %v60_v21 = vpop.permute.xlu0 %59 }
  0x7f   :  { %v50_v23 = vpop.permute.xlu1 %49 }
  0x81   :  { %v55_v27 = vpop.permute.xlu0 %54 }
  0x83   :  { %v45_v32 = vpop.permute.xlu1 %44 }
  0x85   :  { %v190_v41 = vpop.permute.xlu0 %189 }
  0x87   :  { %v185_v43 = vpop.permute.xlu1 %184 }
  0x89   :  { %v180_v47 = vpop.permute.xlu0 %179 }
  0x8b   :  { %v175_v52 = vpop.permute.xlu1 %174 }
  0x8d   :  { %v320_v61 = vpop.permute.xlu0 %319 }
  0x8f   :  { %v315_v63 = vpop.permute.xlu1 %314 }
  0x91   :  { %v310_v3 = vpop.permute.xlu0 %309 }
  0x93   :  { %v305_v8 = vpop.permute.xlu1 %304 }
  0x95   :  { %v428_v14 = vpop.permute.xlu0 %427 }
  0xc6   :  { %v574_v22 = vpop.f32.mrf.mxu0 }
  0xc7   :  { %v147_v29 = vadd.f32 %v574_v22, %v50_v23 }
  0xc8   :  { %v141_v24 = vpop.f32.mrf.mxu0 }
  0xc9   :  { %v142_v33 = vadd.f32 %v141_v24, %v45_v32  ;;  %v161_v35 = vmax.f32 %v147_v29, 0.0 }
  0xca   :  { %v577_v25 = vpop.f32.mrf.mxu0 }
  0xcb   :  { %v157_v26 = vadd.f32 %v577_v25, %v60_v21  ;;  %v160_v36 = vmax.f32 %v142_v33, 0.0 }
  0xcc   :  { %v151_v28 = vpop.f32.mrf.mxu0 }
  0xcd   :  { %v163_v30 = vmax.f32 %v157_v26, 0.0  ;;  %v152_v31 = vadd.f32 %v151_v28, %v55_v27 }
  0xcf   :  { %v162_v34 = vmax.f32 %v152_v31, 0.0  ;;  %578 = vmatprep.subr.mxu1 %v163_v30 }
  0xd0   :  { %579 = vmatpush3.msra.mxu1 %v163_v30 }
  0xd1   :  { %580 = vmatprep.subr.mxu1 %v162_v34 }
  0xd2   :  { %581 = vmatpush3.msra.mxu1 %v162_v34 }
  0xd3   :  { %582 = vmatprep.subr.mxu1 %v161_v35 }
  0xd4   :  { %583 = vmatpush3.msra.mxu1 %v161_v35 }
  0xd5   :  { %584 = vmatprep.subr.mxu1 %v160_v36 }
  0xd6   :  { %585 = vmatpush3.msra.mxu1 %v160_v36 }
  0xd7   :  { %587 = vmatmul.mubr.msk.f32.vlgmr.msra.gmra.mxu1 %vm192_vm1, %v165_v37  ;;  %606 = vmatprep.subr.mxu1 %v627_v60 }
  0xd8   :  { %589 = vmatprep.mubr.msk.f32.mxu1 %vm192_vm1, %v166_v38 }
  0xdb   :  { %590 = vmatmul.mubr.msk.f32.gmra.mxu1 %vm192_vm1, %v167_v39 }
  0xdc   :  { %614 = vmatprep.mubr.msk.f32.mxu1 %vm628_vm2, %v627_v60 }
 0x197   :  { %v588_v42 = vpop.f32.mrf.mxu1 }
 0x198   :  { %v277_v49 = vadd.f32 %v588_v42, %v180_v47 }
 0x199   :  { %v271_v44 = vpop.f32.mrf.mxu1 }
 0x19a   :  { %v272_v53 = vadd.f32 %v271_v44, %v175_v52  ;;  %v291_v55 = vmax.f32 %v277_v49, 0.0 }
 0x19b   :  { %v591_v45 = vpop.f32.mrf.mxu1 }
 0x19c   :  { %v287_v46 = vadd.f32 %v591_v45, %v190_v41  ;;  %v290_v56 = vmax.f32 %v272_v53, 0.0 }
 0x19d   :  { %v281_v48 = vpop.f32.mrf.mxu1 }
 0x19e   :  { %v293_v50 = vmax.f32 %v287_v46, 0.0  ;;  %v282_v51 = vadd.f32 %v281_v48, %v185_v43 }
 0x1a0   :  { %v292_v54 = vmax.f32 %v282_v51, 0.0  ;;  %592 = vmatprep.subr.mxu0 %v293_v50 }
 0x1a1   :  { %593 = vmatpush3.msra.mxu0 %v293_v50 }
 0x1a2   :  { %594 = vmatprep.subr.mxu0 %v292_v54 }
 0x1a3   :  { %595 = vmatpush3.msra.mxu0 %v292_v54 }
 0x1a4   :  { %596 = vmatprep.subr.mxu0 %v291_v55 }
 0x1a5   :  { %597 = vmatpush3.msra.mxu0 %v291_v55 }
 0x1a6   :  { %598 = vmatprep.subr.mxu0 %v290_v56 }
 0x1a7   :  { %599 = vmatpush3.msra.mxu0 %v290_v56 }
 0x1a8   :  { %601 = vmatmul.mubr.msk.f32.vlgmr.msra.gmra.mxu0 %vm192_vm1, %v295_v57 }
 0x1a9   :  { %603 = vmatprep.mubr.msk.f32.mxu0 %vm192_vm1, %v296_v58 }
 0x1ac   :  { %604 = vmatmul.mubr.msk.f32.gmra.mxu0 %vm192_vm1, %v297_v59 }
 0x268   :  { %v602_v62 = vpop.f32.mrf.mxu0 }
 0x269   :  { %v406_v5 = vadd.f32 %v602_v62, %v310_v3 }
 0x26a   :  { %v400_v0 = vpop.f32.mrf.mxu0 }
 0x26b   :  { %v401_v9 = vadd.f32 %v400_v0, %v305_v8  ;;  %v420_v11 = vmax.f32 %v406_v5, 0.0 }
 0x26c   :  { %v605_v1 = vpop.f32.mrf.mxu0 }
 0x26d   :  { %v416_v2 = vadd.f32 %v605_v1, %v320_v61  ;;  %v419_v12 = vmax.f32 %v401_v9, 0.0 }
 0x26e   :  { %v410_v4 = vpop.f32.mrf.mxu0 }
 0x26f   :  { %v422_v6 = vmax.f32 %v416_v2, 0.0  ;;  %v411_v7 = vadd.f32 %v410_v4, %v315_v63 }
 0x271   :  { %v421_v10 = vmax.f32 %v411_v7, 0.0  ;;  %607 = vmatpush3.msra.mxu1 %v422_v6 }
 0x272   :  { %608 = vmatprep.subr.mxu1 %v627_v60 }
 0x273   :  { %609 = vmatpush3.msra.mxu1 %v421_v10 }
 0x274   :  { %610 = vmatprep.subr.mxu1 %v627_v60 }
 0x275   :  { %611 = vmatpush3.msra.mxu1 %v420_v11 }
 0x276   :  { %612 = vmatprep.subr.mxu1 %v627_v60 }
 0x277   :  { %613 = vmatpush3.msra.mxu1 %v419_v12 }
 0x278   :  { %615 = vmatmul.mubr.msk.f32.vlgmr.msra.gmra.mxu1 %vm192_vm1, %v423_v13 }
 0x338   :  { %v499_v15 = vpop.f32.mrf.mxu1 }
 0x339   :  { %v500_v16 = vadd.f32 %v499_v15, %v428_v14 }
 0x33a   :  { %v616_v17 = vpop.f32.mrf.mxu1 }
 0x33b   :  { %v504_v18 = vsel %vm503_vm3, %v500_v16, -inf }
 0x33c   :  { %v505_v19 = vrot.slane %v504_v18, 4 }
 0x33e   :  { %v506_v20 = vmax.f32 %v504_v18, %v505_v19 }
 0x340   :  { %v507_v21 = vrot.slane %v506_v20, 2 }
 0x342   :  { %v508_v22 = vmax.f32 %v506_v20, %v507_v21 }
 0x344   :  { %v509_v23 = vrot.slane %v508_v22, 1 }
 0x346   :  { %v510_v24 = vmax.f32 %v508_v22, %v509_v23 }
 0x348   :  { %v511_v25 = vsub.f32 %v500_v16, %v510_v24 }
 0x34a   :  { %v512_v26 = vmul.f32 1.442695, %v511_v25 }
 0x34c   :  { %622 = vpow2.f32 %v512_v26 }
 0x359   :  { %v623_v27 = vpop.eup %622 }
 0x35a   :  { %v514_v28 = vsel %vm503_vm3, %v623_v27, 0.0 }
 0x35b   :  { %v515_v29 = vrot.slane %v514_v28, 4 }
 0x35d   :  { %v516_v30 = vadd.f32 %v515_v29, %v514_v28 }
 0x35f   :  { %v517_v31 = vrot.slane %v516_v30, 2 }
 0x361   :  { %v518_v32 = vadd.f32 %v517_v31, %v516_v30 }
 0x363   :  { %v519_v33 = vrot.slane %v518_v32, 1 }
 0x365   :  { %v520_v34 = vadd.f32 %v519_v33, %v518_v32 }
 0x367   :  { %624 = vrcp.f32 %v520_v34 }
 0x374   :  { %v625_v35 = vpop.eup %624 }
 0x375   :  { %v522_v36 = vmul.f32 %v625_v35, %v623_v27 }
 0x377   :  { %523 = vst.msk [vmem:[%s791_s9] sm:$0xff] %vm503_vm3, %v522_v36 }

</bundles_post_ra>
